<compile_context>
chip_gen: v6e
topology: v6e:2x2x1
jax: 0.10.0
libtpu: 0.0.40
codegen_flags: <defaults>
</compile_context>

<pallas_src>
import functools

import jax
import jax.numpy as jnp
from jax.experimental import pallas as pl
from jax.experimental.pallas import tpu as pltpu


_SUBLANES = 8
_LANES = 128


def _round_up(x, m):
    return ((x + m - 1) // m) * m


# -----------------------------------------------------------------------------
# Path A: single full-extent block (common case).  No padding, no grid
# bookkeeping, no scratch — one body, one reduce, one SMEM scalar store.
# -----------------------------------------------------------------------------
def _mae_loss_single_kernel(tok_ref, pre_ref, out_ref, *, normalize_length,
                            batch_size):
    tok = tok_ref[...].astype(jnp.float32)
    pre = pre_ref[...].astype(jnp.float32)
    loss = jnp.sum(jnp.abs(tok - pre))
    if normalize_length:
        norm = jnp.sum(tok)
    else:
        norm = jnp.float32(batch_size)
    out_ref[0, 0] = loss / norm


# -----------------------------------------------------------------------------
# Path B: tiled reduction over a lane-dense (8, lanes) slab with VMEM vreg
# accumulators.  Per-step work is pure VPU adds; one XLU reduce at the end.
# -----------------------------------------------------------------------------
def _mae_loss_tiled_kernel(tok_ref, pre_ref, out_ref, acc_diff, *maybe_acc_tok,
                           normalize_length, batch_size):
    i = pl.program_id(0)
    acc_tok = maybe_acc_tok[0] if normalize_length else None

    @pl.when(i == 0)
    def _init():
        acc_diff[...] = jnp.zeros_like(acc_diff)
        if normalize_length:
            acc_tok[...] = jnp.zeros_like(acc_tok)

    tok = tok_ref[...].astype(jnp.float32)
    pre = pre_ref[...].astype(jnp.float32)
    acc_diff[...] += jnp.abs(tok - pre)
    if normalize_length:
        acc_tok[...] += tok

    @pl.when(i == pl.num_programs(0) - 1)
    def _finalize():
        loss = jnp.sum(acc_diff[...])
        if normalize_length:
            norm = jnp.sum(acc_tok[...])
        else:
            norm = jnp.float32(batch_size)
        out_ref[0, 0] = loss / norm


def mae_loss(token_length, pre_token_length, normalize_length=False,
             tile_lanes=32768, single_block_max=131072):
    """Pallas implementation of funasr mae_loss.forward.

    token_length:      (B,) array (any real dtype)
    pre_token_length:  (B,) array (same shape)
    returns: scalar float32 loss
    """
    assert token_length.shape == pre_token_length.shape
    assert token_length.ndim == 1
    b = token_length.shape[0]

    # ---------------- single-block fast path (no padding, no grid) ----------
    if b <= single_block_max:
        tok2d = token_length.reshape(1, b)       # metadata-only reshape
        pre2d = pre_token_length.reshape(1, b)
        kernel = functools.partial(
            _mae_loss_single_kernel,
            normalize_length=normalize_length, batch_size=b)
        out = pl.pallas_call(
            kernel,
            out_shape=jax.ShapeDtypeStruct((1, 1), jnp.float32),
            in_specs=[
                pl.BlockSpec(memory_space=pltpu.MemorySpace.VMEM),
                pl.BlockSpec(memory_space=pltpu.MemorySpace.VMEM),
            ],
            out_specs=pl.BlockSpec(memory_space=pltpu.MemorySpace.SMEM),
        )(tok2d, pre2d)
        return out[0, 0]

    # ---------------- tiled path for huge B ---------------------------------
    # Lane-dense (8, lanes) slab; zero padding is exact for both the L1 sum
    # (|0 - 0| = 0) and the normalizer (sum of zeros).
    lanes = _round_up(pl.cdiv(b, _SUBLANES), _LANES)
    tile = min(_round_up(tile_lanes, _LANES), lanes)
    lanes = _round_up(lanes, tile)
    padded = _SUBLANES * lanes

    tok2d = jnp.pad(token_length, (0, padded - b)).reshape(_SUBLANES, lanes)
    pre2d = jnp.pad(pre_token_length, (0, padded - b)).reshape(_SUBLANES, lanes)

    grid = lanes // tile

    scratch_shapes = [pltpu.VMEM((_SUBLANES, tile), jnp.float32)]
    if normalize_length:
        scratch_shapes.append(pltpu.VMEM((_SUBLANES, tile), jnp.float32))

    kernel = functools.partial(
        _mae_loss_tiled_kernel,
        normalize_length=normalize_length, batch_size=b)

    out = pl.pallas_call(
        kernel,
        out_shape=jax.ShapeDtypeStruct((1, 1), jnp.float32),
        grid=(grid,),
        in_specs=[
            pl.BlockSpec((_SUBLANES, tile), lambda i: (0, i)),
            pl.BlockSpec((_SUBLANES, tile), lambda i: (0, i)),
        ],
        out_specs=pl.BlockSpec(memory_space=pltpu.MemorySpace.SMEM),
        scratch_shapes=scratch_shapes,
        compiler_params=pltpu.CompilerParams(
            dimension_semantics=("arbitrary",)
        ),
    )(tok2d, pre2d)

    return out[0, 0]


if __name__ == "__main__":
    key = jax.random.PRNGKey(0)
    k1, k2, k3, k4 = jax.random.split(key, 4)

    # --- small case (typical CIF batch) -> single-block fast path ---
    B = 8
    token_length = jax.random.uniform(k1, (B,), dtype=jnp.float32) * 10.0
    pre_token_length = jax.random.uniform(k2, (B,), dtype=jnp.float32) * 10.0

    loss = mae_loss(token_length, pre_token_length, normalize_length=False)
    loss = jax.block_until_ready(loss)
    ref = jnp.sum(jnp.abs(token_length - pre_token_length)) / B
    assert jnp.allclose(loss, ref, rtol=1e-5, atol=1e-6), (loss, ref)

    loss_norm = mae_loss(token_length, pre_token_length, normalize_length=True)
    loss_norm = jax.block_until_ready(loss_norm)
    ref_norm = jnp.sum(jnp.abs(token_length - pre_token_length)) / jnp.sum(
        token_length
    )
    assert jnp.allclose(loss_norm, ref_norm, rtol=1e-5, atol=1e-6), (
        loss_norm,
        ref_norm,
    )

    # --- larger case, still single block (no padding copies) ---
    B2 = 2500
    tok2 = jax.random.uniform(k3, (B2,), dtype=jnp.float32) * 10.0
    pre2 = jax.random.uniform(k4, (B2,), dtype=jnp.float32) * 10.0

    loss2 = mae_loss(tok2, pre2, normalize_length=False)
    loss2 = jax.block_until_ready(loss2)
    ref2 = jnp.sum(jnp.abs(tok2 - pre2)) / B2
    assert jnp.allclose(loss2, ref2, rtol=1e-5, atol=1e-5), (loss2, ref2)

    # --- force the tiled path (multiple grid steps, VMEM accumulators) ---
    loss3 = mae_loss(tok2, pre2, normalize_length=False,
                     tile_lanes=128, single_block_max=0)
    loss3 = jax.block_until_ready(loss3)
    assert jnp.allclose(loss3, ref2, rtol=1e-5, atol=1e-5), (loss3, ref2)

    loss3n = mae_loss(tok2, pre2, normalize_length=True,
                      tile_lanes=128, single_block_max=0)
    loss3n = jax.block_until_ready(loss3n)
    ref2n = jnp.sum(jnp.abs(tok2 - pre2)) / jnp.sum(tok2)
    assert jnp.allclose(loss3n, ref2n, rtol=1e-5, atol=1e-5), (loss3n, ref2n)

    print("KERNEL_OK")
</pallas_src>

<mosaic_0001>
module attributes {stable_mosaic.version = 11 : i64} {
  func.func @_mae_loss_single_kernel(%arg0: memref<1x8xf32, #tpu.memory_space<vmem>>, %arg1: memref<1x8xf32, #tpu.memory_space<vmem>>, %arg2: memref<1x1xf32, #tpu.memory_space<smem>>) attributes {dimension_semantics = [], scalar_prefetch = 0 : i64, scratch_operands = 0 : i64, tpu.core_type = #tpu.core_type<tc>} {
    %c0 = arith.constant 0 : index
    %c0_0 = arith.constant 0 : index
    %0 = vector.load %arg0[%c0, %c0_0] : memref<1x8xf32, #tpu.memory_space<vmem>>, vector<1x8xf32>
    %c0_1 = arith.constant 0 : index
    %c0_2 = arith.constant 0 : index
    %1 = vector.load %arg1[%c0_1, %c0_2] : memref<1x8xf32, #tpu.memory_space<vmem>>, vector<1x8xf32>
    %2 = arith.subf %0, %1 : vector<1x8xf32>
    %3 = math.absf %2 : vector<1x8xf32>
    %4 = vector.shape_cast %3 : vector<1x8xf32> to vector<1x1x8xf32>
    %cst = arith.constant dense<0.000000e+00> : vector<1xf32>
    %5 = vector.multi_reduction <add>, %4, %cst [1, 2] : vector<1x1x8xf32> to vector<1xf32>
    %6 = vector.shape_cast %5 : vector<1xf32> to vector<1x1x1xf32>
    %7 = vector.extract %6[0, 0, 0] : f32 from vector<1x1x1xf32>
    %cst_3 = arith.constant 8.000000e+00 : f32
    %8 = arith.divf %7, %cst_3 : f32
    %c0_4 = arith.constant 0 : index
    %c0_5 = arith.constant 0 : index
    %9 = memref.load %arg2[%c0_4, %c0_5] : memref<1x1xf32, #tpu.memory_space<smem>>
    memref.store %8, %arg2[%c0_4, %c0_5] : memref<1x1xf32, #tpu.memory_space<smem>>
    return
  }
}

</mosaic_0001>

<bundles_post_ra>
// kernel: tpu_custom_call.1
= control target key start
LH: loop header
LB: loop body
LE: loop exit
PB: predicated region body
PF: predicated region fallthrough
CT: control target
= control target key end

     0   :  { %7 = vsyncpa [#allocation3], 0  ;;  %s120_s0 = inlined_call_operand.hbm [shape: f32[1,8], index: 0, kind: input, shape index: {}]   ;;  %s121_s1 = inlined_call_operand.vmem [shape: f32[1,8], index: 1, kind: input, shape index: {}]   ;;  %s122_s2 = inlined_call_operand.hbm [shape: f32[1,1], index: 2, kind: output, shape index: {}]  }
   0x1   :  { %8 = vsyncpa [#allocation4], 0  ;;  %s94_s9 = smov [#allocation2]  }
   0x2   :  { %s15_s10 = sshll.u32 %s94_s9, 4  ;;  %s16_s10 = int_to_ptr.vmem [resolvable:$true] %s15_s10 }
   0x3   :  { %s70_s11 = scalar_lea.vmem %s16_s10, 16  ;;  %s74_s12 = scalar_lea.vmem %s16_s10, 32 }
   0x4   :  { %p71_p0 = scmp.ne.s32.totalorder %s16_s10, %s70_s11  ;;  %p75_p1 = scmp.lt.s32.totalorder %s16_s10, %s16_s10 }
   0x5   :  { %p76_p2 = scmp.lt.s32.totalorder %s74_s12, %s70_s11 }
   0x7   :  { %p77_p3 = por %p76_p2, %p75_p1 }
   0x9   :  { %p78_p4 = pnand %p77_p3, %p71_p0 }
   0xb   :  { %81 = shalt.err (!%p78_p4)
}
   0xc   :  { %18 = dma.hbm_to_vmem [thread:$0]  %s120_s0, 16, %s16_s10, [#allocation3]  }
   0xd   :  { %90 = dma.done.wait [#allocation3], 16  }
   0xe   :  { %91 = vsyncadd [#allocation3], 4294967280  ;;  %v24_v0 = vld [vmem:[#allocation2] sm:$0x1]  ;;  %vm28_vm0 = vcmask 57344   ;;  %s95_s18 = smov [#allocation5]  }
   0xf   :  { %v25_v1 = vld [vmem:[%s121_s1] sm:$0x1] }
  0x10   :  { %v26_v2 = vsub.f32 %v24_v0, %v25_v1 }
  0x12   :  { %v27_v3 = vand.u32 2147483647, %v26_v2 }
  0x14   :  { %v29_v4 = vsel %vm28_vm0, %v27_v3, 0.0 }
  0x15   :  { %30 = vadd.xlane.f32.xlu0 %v29_v4 }
  0x9e   :  { %v31_v5 = vpop.xlane.xlu0 %30 }
  0x9f   :  { %v32_v6 = vrot.slane %v31_v5, 4 }
  0xa1   :  { %v33_v7 = vadd.f32 %v32_v6, %v31_v5 }
  0xa3   :  { %v34_v8 = vrot.slane %v33_v7, 2 }
  0xa5   :  { %v35_v9 = vadd.f32 %v34_v8, %v33_v7 }
  0xa7   :  { %v36_v10 = vrot.slane %v35_v9, 1 }
  0xa9   :  { %v37_v11 = vadd.f32 %v36_v10, %v35_v9 }
  0xab   :  { %58 = vpush %v37_v11 }
  0xdc   :  { %s59_s0 = spop %58 }
  0xdd   :  { %s41_s17 = smul.f32 0.125, %s59_s0 }
  0xdf   :  { %43 = sst [smem:[#allocation5]] %s41_s17 }
  0xe0   :  { %51 = dma.smem_to_hbm %s95_s18, 16, %s122_s2, [#allocation4]  }
  0xe1   :  { %92 = dma.done.wait [#allocation4], 16  }
  0xe2   :  { %93 = vsyncadd [#allocation4], 4294967280 }
  0xe3   :  { %55 = sfence }
  0xe4   :  { %56 = vsyncpa [#allocation3], 1 }
  0xe5   :  { %57 = vsyncpa [#allocation4], 1 }

</bundles_post_ra>
